<compile_context>
chip_gen: v7x
topology: tpu7x:2x2x1
jax: 0.10.0
libtpu: 0.0.40
codegen_flags: <defaults>
</compile_context>

<pallas_src>
import functools

import jax
import jax.numpy as jnp
from jax import lax
from jax.experimental import pallas as pl
from jax.experimental.pallas import tpu as pltpu


# ---------------------------------------------------------------------------
# Path A: z kept VMEM-resident (pre-projected & transposed); per-tile row/col
# gather done in-kernel via one-hot MXU matmuls.  Output is lane-dense (1, te).
# ---------------------------------------------------------------------------
def edge_decoder_resident_kernel(row_ref, col_ref, zat_ref, zbt_ref, w2t_ref, out_ref):
    n = zat_ref.shape[1]                      # number of author nodes (static)
    te = row_ref.shape[1]                     # edges per tile (static)
    niota = lax.broadcasted_iota(jnp.int32, (n, te), 0)
    oh_r = (niota == row_ref[...]).astype(jnp.float32)       # (N, te) one-hot gather
    oh_c = (niota == col_ref[...]).astype(jnp.float32)       # (N, te)
    # hT[:, e] = (z @ W1[:H] + b1)[row[e], :] + (z @ W1[H:])[col[e], :]
    ht = (jnp.dot(zat_ref[...], oh_r, preferred_element_type=jnp.float32)
          + jnp.dot(zbt_ref[...], oh_c, preferred_element_type=jnp.float32))   # (H, te)
    ht = jnp.maximum(ht, 0.0)                                  # relu
    # lin2 (H -> 1): (1,H)@(H,te) -> directly lane-dense (1, te), no relayout.
    out_ref[...] = jnp.dot(w2t_ref[...], ht, preferred_element_type=jnp.float32)


# ---------------------------------------------------------------------------
# Path B (fallback for very large N): pre-projected rows gathered in the wrapper,
# kernel does relu + lin2 with the same lane-dense (1, te) output.
# ---------------------------------------------------------------------------
def edge_decoder_gathered_kernel(hpre_ref, w2t_ref, out_ref):
    h = jnp.maximum(hpre_ref[...], 0.0)                        # (te, H)
    out_ref[...] = lax.dot_general(
        w2t_ref[...], h, (((1,), (1,)), ((), ())),
        preferred_element_type=jnp.float32)                    # (1, te)


def _pick_tile(num_edges, te):
    """Round te to a multiple of 128; keep grid >= 2 when the edge count allows."""
    te = max(128, (te // 128) * 128)
    e128 = pl.cdiv(num_edges, 128) * 128
    if e128 >= 256:
        te = min(te, ((e128 // 2) // 128) * 128)
    else:
        te = 128
    return te


@functools.partial(jax.jit,
                   static_argnames=("te", "vmem_limit_bytes", "force_hbm_gather"))
def edge_decoder(z_author, edge_label_index, w1, b1, w2, b2, *, te=2048,
                 vmem_limit_bytes=None, force_hbm_gather=False):
    """z_author: (N, H) node embeddings.
    edge_label_index: (2, E) int indices into z_author.
    w1: (2H, H), b1: (H,), w2: (H, 1), b2: (1,)  (input-major, i.e. x @ W + b).
    Returns (E,) float32, matching torch's z.view(-1)."""
    N, H = z_author.shape
    E = edge_label_index.shape[1]

    te = _pick_tile(E, te)
    E_pad = pl.cdiv(E, te) * te
    grid = (E_pad // te,)

    row = edge_label_index[0].astype(jnp.int32)
    col = edge_label_index[1].astype(jnp.int32)
    if E_pad != E:
        # Pad only the 4 B/edge index vectors (never the gathered activations);
        # padded entries use node 0 (valid -> no OOB VMEM reads) and are sliced off.
        row = jnp.pad(row, (0, E_pad - E))
        col = jnp.pad(col, (0, E_pad - E))

    z = z_author.astype(jnp.float32)
    w1 = w1.astype(jnp.float32)
    b1 = b1.astype(jnp.float32)
    w2 = w2.astype(jnp.float32)

    # One-time tiny pre-projections:  lin1(cat[z_r, z_c]) = za[row] + zb[col]
    hi = jax.lax.Precision.HIGHEST
    za = jnp.dot(z, w1[:H, :], precision=hi) + b1[None, :]     # (N, H), b1 folded in
    zb = jnp.dot(z, w1[H:, :], precision=hi)                   # (N, H)
    w2t = w2.reshape(1, H)                                      # (1, H)

    cp_kwargs = dict(dimension_semantics=("parallel",))
    if vmem_limit_bytes is not None:
        cp_kwargs["vmem_limit_bytes"] = vmem_limit_bytes

    # Budget the (N, te) one-hot gather tiles; above this, fall back to HBM gather.
    use_resident = (not force_hbm_gather) and (N * te * 4 <= 8 * 1024 * 1024)

    if use_resident:
        out = pl.pallas_call(
            edge_decoder_resident_kernel,
            out_shape=jax.ShapeDtypeStruct((1, E_pad), jnp.float32),
            grid_spec=pltpu.PrefetchScalarGridSpec(
                num_scalar_prefetch=0,
                grid=grid,
                in_specs=[
                    pl.BlockSpec((1, te), lambda i: (0, i)),   # row indices (lane-major)
                    pl.BlockSpec((1, te), lambda i: (0, i)),   # col indices (lane-major)
                    pl.BlockSpec((H, N), lambda i: (0, 0)),    # (z@W1[:H]+b1)^T, resident
                    pl.BlockSpec((H, N), lambda i: (0, 0)),    # (z@W1[H:])^T,    resident
                    pl.BlockSpec((1, H), lambda i: (0, 0)),    # w2^T,            resident
                ],
                out_specs=pl.BlockSpec((1, te), lambda i: (0, i)),   # lane-dense output
            ),
            compiler_params=pltpu.CompilerParams(**cp_kwargs),
        )(row.reshape(1, E_pad), col.reshape(1, E_pad), za.T, zb.T, w2t)
    else:
        # Fallback: gather the pre-projected (E_pad, H) rows in the (fused) wrapper.
        hpre = jnp.take(za, row, axis=0) + jnp.take(zb, col, axis=0)
        out = pl.pallas_call(
            edge_decoder_gathered_kernel,
            out_shape=jax.ShapeDtypeStruct((1, E_pad), jnp.float32),
            grid_spec=pltpu.PrefetchScalarGridSpec(
                num_scalar_prefetch=0,
                grid=grid,
                in_specs=[
                    pl.BlockSpec((te, H), lambda i: (i, 0)),   # pre-activation tile
                    pl.BlockSpec((1, H), lambda i: (0, 0)),    # w2^T, resident
                ],
                out_specs=pl.BlockSpec((1, te), lambda i: (0, i)),
            ),
            compiler_params=pltpu.CompilerParams(**cp_kwargs),
        )(hpre, w2t)

    # lin2 bias added outside the kernel; slice off padding; flatten (z.view(-1)).
    return out.reshape(-1)[:E] + b2[0]


def edge_decoder_ref(z_author, edge_label_index, w1, b1, w2, b2):
    hi = jax.lax.Precision.HIGHEST
    row, col = edge_label_index[0], edge_label_index[1]
    z = jnp.concatenate([z_author[row], z_author[col]], axis=-1)
    z = jnp.maximum(jnp.dot(z, w1, precision=hi) + b1, 0.0)
    z = jnp.dot(z, w2, precision=hi) + b2
    return z.reshape(-1)


if __name__ == "__main__":
    key = jax.random.PRNGKey(0)
    H = 32          # hidden_channels
    N = 64          # number of 'author' nodes
    E = 500         # number of edges (not a multiple of 128, exercises index padding)

    k1, k2, k3, k4, k5, k6, k7 = jax.random.split(key, 7)

    z_author = jax.random.normal(k1, (N, H), dtype=jnp.float32)
    edge_label_index = jnp.stack([
        jax.random.randint(k2, (E,), 0, N, dtype=jnp.int32),
        jax.random.randint(k3, (E,), 0, N, dtype=jnp.int32),
    ], axis=0)

    # Parameters of Linear(2H -> H), Linear(H -> 1), stored input-major (in, out).
    w1 = jax.random.normal(k4, (2 * H, H), dtype=jnp.float32) * 0.1
    b1 = jax.random.normal(k5, (H,), dtype=jnp.float32) * 0.1
    w2 = jax.random.normal(k6, (H, 1), dtype=jnp.float32) * 0.1
    b2 = jax.random.normal(k7, (1,), dtype=jnp.float32) * 0.1

    ref = edge_decoder_ref(z_author, edge_label_index, w1, b1, w2, b2)

    # Default path: VMEM-resident projections + in-kernel one-hot gather.
    out = jax.block_until_ready(
        edge_decoder(z_author, edge_label_index, w1, b1, w2, b2))
    assert out.shape == (E,)
    assert jnp.allclose(out, ref, atol=1e-5, rtol=1e-5), "resident path mismatch"

    # Fallback path (used automatically for very large N).
    out_fb = jax.block_until_ready(
        edge_decoder(z_author, edge_label_index, w1, b1, w2, b2,
                     force_hbm_gather=True))
    assert jnp.allclose(out_fb, ref, atol=1e-5, rtol=1e-5), "fallback path mismatch"

    print("KERNEL_OK")
</pallas_src>

<mosaic_0001>
module attributes {stable_mosaic.version = 11 : i64} {
  func.func @edge_decoder_resident_kernel(%arg0: i32, %arg1: memref<1x256xi32, #tpu.memory_space<vmem>>, %arg2: memref<1x256xi32, #tpu.memory_space<vmem>>, %arg3: memref<32x64xf32, #tpu.memory_space<vmem>>, %arg4: memref<32x64xf32, #tpu.memory_space<vmem>>, %arg5: memref<1x32xf32, #tpu.memory_space<vmem>>, %arg6: memref<1x256xf32, #tpu.memory_space<vmem>>) attributes {dimension_semantics = [#tpu.dimension_semantics<parallel>], iteration_bounds = array<i64: 2>, scalar_prefetch = 0 : i64, scratch_operands = 0 : i64, tpu.core_type = #tpu.core_type<tc>, window_params = [{transform_indices = @transform_0, window_bounds = array<i64: 1, 256>}, {transform_indices = @transform_1, window_bounds = array<i64: 1, 256>}, {pipeline_mode = #tpu.pipeline_mode<synchronous>, transform_indices = @transform_2, window_bounds = array<i64: 32, 64>}, {pipeline_mode = #tpu.pipeline_mode<synchronous>, transform_indices = @transform_3, window_bounds = array<i64: 32, 64>}, {pipeline_mode = #tpu.pipeline_mode<synchronous>, transform_indices = @transform_4, window_bounds = array<i64: 1, 32>}, {transform_indices = @transform_5, window_bounds = array<i64: 1, 256>}]} {
    %0 = tpu.iota {dimensions = array<i32: 0>} : vector<64x256xi32>
    %c0 = arith.constant 0 : index
    %c0_0 = arith.constant 0 : index
    %1 = vector.load %arg1[%c0, %c0_0] : memref<1x256xi32, #tpu.memory_space<vmem>>, vector<1x256xi32>
    %2 = vector.broadcast %1 : vector<1x256xi32> to vector<64x256xi32>
    %3 = arith.cmpi eq, %0, %2 : vector<64x256xi32>
    %4 = arith.extui %3 : vector<64x256xi1> to vector<64x256xi32>
    %5 = arith.sitofp %4 : vector<64x256xi32> to vector<64x256xf32>
    %c0_1 = arith.constant 0 : index
    %c0_2 = arith.constant 0 : index
    %6 = vector.load %arg2[%c0_1, %c0_2] : memref<1x256xi32, #tpu.memory_space<vmem>>, vector<1x256xi32>
    %7 = vector.broadcast %6 : vector<1x256xi32> to vector<64x256xi32>
    %8 = arith.cmpi eq, %0, %7 : vector<64x256xi32>
    %9 = arith.extui %8 : vector<64x256xi1> to vector<64x256xi32>
    %10 = arith.sitofp %9 : vector<64x256xi32> to vector<64x256xf32>
    %c0_3 = arith.constant 0 : index
    %c0_4 = arith.constant 0 : index
    %11 = vector.load %arg3[%c0_3, %c0_4] : memref<32x64xf32, #tpu.memory_space<vmem>>, vector<32x64xf32>
    %cst = arith.constant dense<0.000000e+00> : vector<32x256xf32>
    %12 = tpu.matmul %11, %5, %cst {dimension_numbers = #tpu.dot_dimension_numbers<[1], [0], [0], [1], [0, 0, 1, 1], [], []>} : vector<32x64xf32>, vector<64x256xf32>, vector<32x256xf32> -> vector<32x256xf32>
    %c0_5 = arith.constant 0 : index
    %c0_6 = arith.constant 0 : index
    %13 = vector.load %arg4[%c0_5, %c0_6] : memref<32x64xf32, #tpu.memory_space<vmem>>, vector<32x64xf32>
    %cst_7 = arith.constant dense<0.000000e+00> : vector<32x256xf32>
    %14 = tpu.matmul %13, %10, %cst_7 {dimension_numbers = #tpu.dot_dimension_numbers<[1], [0], [0], [1], [0, 0, 1, 1], [], []>} : vector<32x64xf32>, vector<64x256xf32>, vector<32x256xf32> -> vector<32x256xf32>
    %15 = arith.addf %12, %14 : vector<32x256xf32>
    %cst_8 = arith.constant 0.000000e+00 : f32
    %16 = vector.broadcast %cst_8 : f32 to vector<32x256xf32>
    %17 = arith.maximumf %15, %16 : vector<32x256xf32>
    %c0_9 = arith.constant 0 : index
    %c0_10 = arith.constant 0 : index
    %18 = vector.load %arg5[%c0_9, %c0_10] : memref<1x32xf32, #tpu.memory_space<vmem>>, vector<1x32xf32>
    %cst_11 = arith.constant dense<0.000000e+00> : vector<1x256xf32>
    %19 = tpu.matmul %18, %17, %cst_11 {dimension_numbers = #tpu.dot_dimension_numbers<[1], [0], [0], [1], [0, 0, 1, 1], [], []>} : vector<1x32xf32>, vector<32x256xf32>, vector<1x256xf32> -> vector<1x256xf32>
    %c0_12 = arith.constant 0 : index
    %c0_13 = arith.constant 0 : index
    %20 = vector.load %arg6[%c0_12, %c0_13] : memref<1x256xf32, #tpu.memory_space<vmem>>, vector<1x256xf32>
    tpu.vector_store %arg6[%c0_12, %c0_13], %19 {strides = array<i32>} : memref<1x256xf32, #tpu.memory_space<vmem>>, vector<1x256xf32>,
    return
  }
  func.func @transform_0(%arg0: i32) -> (i32, i32) {
    %c0_i32 = arith.constant 0 : i32
    %c0_i32_0 = arith.constant 0 : i32
    return %c0_i32, %arg0 : i32, i32
  }
  func.func @transform_1(%arg0: i32) -> (i32, i32) {
    %c0_i32 = arith.constant 0 : i32
    %c0_i32_0 = arith.constant 0 : i32
    return %c0_i32, %arg0 : i32, i32
  }
  func.func @transform_2(%arg0: i32) -> (i32, i32) {
    %c0_i32 = arith.constant 0 : i32
    %c0_i32_0 = arith.constant 0 : i32
    %c0_i32_1 = arith.constant 0 : i32
    return %c0_i32, %c0_i32_0 : i32, i32
  }
  func.func @transform_3(%arg0: i32) -> (i32, i32) {
    %c0_i32 = arith.constant 0 : i32
    %c0_i32_0 = arith.constant 0 : i32
    %c0_i32_1 = arith.constant 0 : i32
    return %c0_i32, %c0_i32_0 : i32, i32
  }
  func.func @transform_4(%arg0: i32) -> (i32, i32) {
    %c0_i32 = arith.constant 0 : i32
    %c0_i32_0 = arith.constant 0 : i32
    %c0_i32_1 = arith.constant 0 : i32
    return %c0_i32, %c0_i32_0 : i32, i32
  }
  func.func @transform_5(%arg0: i32) -> (i32, i32) {
    %c0_i32 = arith.constant 0 : i32
    %c0_i32_0 = arith.constant 0 : i32
    return %c0_i32, %arg0 : i32, i32
  }
}

</mosaic_0001>

<bundles_post_ra>
// kernel: edge_decoder.1
= control target key start
LH: loop header
LB: loop body
LE: loop exit
PB: predicated region body
PF: predicated region fallthrough
CT: control target
= control target key end

     0   :  { %s922_s18 = smov 0   ;;  %s1049_s0 = inlined_call_operand.vmem [shape: s32[1,512], index: 0, kind: input, shape index: {}]   ;;  %s1050_s1 = inlined_call_operand.vmem [shape: s32[1,512], index: 1, kind: input, shape index: {}]   ;;  %s1051_s2 = inlined_call_operand.vmem [shape: f32[32,64], index: 2, kind: input, shape index: {}]   ;;  %s1052_s3 = inlined_call_operand.vmem [shape: f32[32,64], index: 3, kind: input, shape index: {}]   ;;  %s1053_s4 = inlined_call_operand.vmem [shape: f32[1,32], index: 4, kind: input, shape index: {}]   ;;  %s1054_s5 = inlined_call_operand.vmem [shape: f32[1,512], index: 5, kind: output, shape index: {}]  }
   0x1 LB: > { %s739_s19 = sadd.s32 4294967295, %s887_s18   ;;  %p743_p0 = scmp.ge.s32.totalorder %s887_s18, 1  ;;  %s887_s18 = sphi %s922_s18, %s15_s18  }
   0x2   : > { %p197_p1 = scmp.lt.s32.totalorder %s887_s18, 3 }
   0x4   : > { %p198_p2 = pnand %p743_p0, %p197_p1 }
   0x5   : > { %s744_s20 = sshll.u32 (!%p198_p2), %s739_s19, 1  ;;  %v242_v0 = vlaneseq (!%p198_p2)  ;;  %v889_v1 = vmov (!%p198_p2), 0.0   ;;  %v890_v14 = vmov (!%p198_p2), 1.0|1.0   ;;  %v369_v19 = vld [vmem:[%s1052_s3] sm:$0xff] (!%p198_p2)  ;;  %v370_v21 = vld [vmem:[%s1052_s3 + $0x8] sm:$0xff] (!%p198_p2) }
   0x6   : > { %201 = sbr.rel (%p198_p2) target bundleno = 493 (0x1ed), region = 40  ;;  %p228_p3 = scmp.lt.s32.totalorder (!%p198_p2), %s744_s20, 3  ;;  %450 = vmatprep.mubr.f32.mxu1 (!%p198_p2), %v889_v1  ;;  %551 = vmatprep.mubr.f32.mxu0 (!%p198_p2), %v889_v1  ;;  %v365_v20 = vld [vmem:[%s1051_s2] sm:$0xff] (!%p198_p2)  ;;  %v366_v22 = vld [vmem:[%s1051_s2 + $0x8] sm:$0xff] (!%p198_p2)  ;;  %v371_v23 = vld [vmem:[%s1052_s3 + $0x10] sm:$0xff] (!%p198_p2) }
   0x7   : > { %v933_v2 = vshrl.u32 (!%p198_p2), %v242_v0, 7  ;;  %v367_v24 = vld [vmem:[%s1051_s2 + $0x10] sm:$0xff] (!%p198_p2)  ;;  %v372_v25 = vld [vmem:[%s1052_s3 + $0x18] sm:$0xff] (!%p198_p2)  ;;  %v584_v63 = vld [vmem:[%s1053_s4] sm:$0x1] (!%p198_p2) }
   0x8   : > { %v368_v26 = vld [vmem:[%s1051_s2 + $0x18] sm:$0xff] (!%p198_p2) }
   0x9   : > { %v258_v3 = vsub.s32 (!%p198_p2), 1, %v933_v2  ;;  %v254_v4 = vsub.s32 (!%p198_p2), 0, %v933_v2  ;;  %v244_v5 = vadd.s32 (!%p198_p2), 8, %v933_v2  ;;  %v245_v8 = vadd.s32 (!%p198_p2), 16, %v933_v2 }
   0xa   : > { %v246_v9 = vadd.s32 (!%p198_p2), 24, %v933_v2  ;;  %v247_v15 = vadd.s32 (!%p198_p2), 32, %v933_v2  ;;  %v248_v16 = vadd.s32 (!%p198_p2), 40, %v933_v2  ;;  %v249_v17 = vadd.s32 (!%p198_p2), 48, %v933_v2 }
   0xb   : > { %v250_v18 = vadd.s32 (!%p198_p2), 56, %v933_v2 }
   0xd   : > { %s1056_s20 = smov (!%p228_p3, %s744_s20), 3 }
   0xe   : > { %s235_s23 = scalar_lea.vmem %s1050_s1, %s1056_s20  ;;  %s230_s26 = scalar_lea.vmem %s1049_s0, %s1056_s20 }
   0xf   : > { %v308_v6 = vld [vmem:[%s235_s23] sm:$0x3]  ;;  %s240_s24 = scalar_lea.vmem %s1054_s5, %s1056_s20 }
  0x10   : > { %v251_v7 = vld [vmem:[%s230_s26] sm:$0x3]  ;;  %v950_v10 = vrot.slane %v308_v6, %v258_v3  ;;  %v954_v12 = vrot.slane %v308_v6, %v254_v4 }
  0x11   : > { %v952_v11 = vrot.slane %v251_v7, %v258_v3  ;;  %v956_v13 = vrot.slane %v251_v7, %v254_v4 }
  0x12   : > { %vm318_vm0 = vcmp.eq.s32.totalorder %v933_v2, %v950_v10  ;;  %vm320_vm1 = vcmp.eq.s32.totalorder %v244_v5, %v950_v10  ;;  %vm317_vm5 = vcmp.eq.s32.totalorder %v933_v2, %v954_v12  ;;  %vm319_vm6 = vcmp.eq.s32.totalorder %v244_v5, %v954_v12 }
  0x13   : > { %vm261_vm2 = vcmp.eq.s32.totalorder %v933_v2, %v952_v11  ;;  %vm263_vm3 = vcmp.eq.s32.totalorder %v244_v5, %v952_v11  ;;  %vm822_vm4 = vmpackc.low %vm320_vm1, %vm318_vm0  ;;  %vm260_vm7 = vcmp.eq.s32.totalorder %v933_v2, %v956_v13  ;;  %vm262_vm8 = vcmp.eq.s32.totalorder %v244_v5, %v956_v13 }
  0x14   : > { %823 = vmatprep.subr.msk.bf16.mxu1 %vm822_vm4, %v890_v14  ;;  %vm838_vm9 = vmpackc.low %vm263_vm3, %vm261_vm2  ;;  %vm322_vm10 = vcmp.eq.s32.totalorder %v245_v8, %v950_v10  ;;  %vm324_vm11 = vcmp.eq.s32.totalorder %v246_v9, %v950_v10  ;;  %vm265_vm13 = vcmp.eq.s32.totalorder %v245_v8, %v952_v11  ;;  %vm267_vm14 = vcmp.eq.s32.totalorder %v246_v9, %v952_v11 }
  0x15   : > { %839 = vmatprep.subr.msk.bf16.mxu0 %vm838_vm9, %v890_v14  ;;  %vm824_vm12 = vmpackc.low %vm319_vm6, %vm317_vm5  ;;  %vm321_vm0 = vcmp.eq.s32.totalorder %v245_v8, %v954_v12  ;;  %vm323_vm1 = vcmp.eq.s32.totalorder %v246_v9, %v954_v12  ;;  %vm264_vm3 = vcmp.eq.s32.totalorder %v245_v8, %v956_v13  ;;  %vm266_vm4 = vcmp.eq.s32.totalorder %v246_v9, %v956_v13 }
  0x16   : > { %825 = vmatpush1.bf16.msk.msra.mxu1 %vm824_vm12, %v890_v14  ;;  %vm840_vm15 = vmpackc.low %vm262_vm8, %vm260_vm7  ;;  %vm326_vm5 = vcmp.eq.s32.totalorder %v247_v15, %v950_v10  ;;  %vm328_vm6 = vcmp.eq.s32.totalorder %v248_v16, %v950_v10  ;;  %vm269_vm8 = vcmp.eq.s32.totalorder %v247_v15, %v952_v11  ;;  %vm325_vm12 = vcmp.eq.s32.totalorder %v247_v15, %v954_v12 }
  0x17   : > { %841 = vmatpush1.bf16.msk.msra.mxu0 %vm840_vm15, %v890_v14  ;;  %vm826_vm2 = vmpackc.low %vm324_vm11, %vm322_vm10  ;;  %vm271_vm10 = vcmp.eq.s32.totalorder %v248_v16, %v952_v11  ;;  %vm268_vm15 = vcmp.eq.s32.totalorder %v247_v15, %v956_v13 }
  0x18   : > { %827 = vmatprep.subr.msk.bf16.mxu1 %vm826_vm2, %v890_v14  ;;  %vm842_vm9 = vmpackc.low %vm267_vm14, %vm265_vm13  ;;  %vm327_vm13 = vcmp.eq.s32.totalorder %v248_v16, %v954_v12  ;;  %vm270_vm2 = vcmp.eq.s32.totalorder %v248_v16, %v956_v13 }
  0x19   : > { %843 = vmatprep.subr.msk.bf16.mxu0 %vm842_vm9, %v890_v14  ;;  %vm828_vm7 = vmpackc.low %vm323_vm1, %vm321_vm0  ;;  %vm330_vm0 = vcmp.eq.s32.totalorder %v249_v17, %v950_v10  ;;  %vm332_vm1 = vcmp.eq.s32.totalorder %v250_v18, %v950_v10 }
  0x1a   : > { %829 = vmatpush1.bf16.msk.msra.mxu1 %vm828_vm7, %v890_v14  ;;  %vm844_vm11 = vmpackc.low %vm266_vm4, %vm264_vm3  ;;  %vm273_vm3 = vcmp.eq.s32.totalorder %v249_v17, %v952_v11  ;;  %vm275_vm4 = vcmp.eq.s32.totalorder %v250_v18, %v952_v11 }
  0x1b   : > { %845 = vmatpush1.bf16.msk.msra.mxu0 %vm844_vm11, %v890_v14  ;;  %vm830_vm14 = vmpackc.low %vm328_vm6, %vm326_vm5  ;;  %vm329_vm5 = vcmp.eq.s32.totalorder %v249_v17, %v954_v12  ;;  %vm331_vm6 = vcmp.eq.s32.totalorder %v250_v18, %v954_v12 }
  0x1c   : > { %831 = vmatprep.subr.msk.bf16.mxu1 %vm830_vm14, %v890_v14  ;;  %vm846_vm9 = vmpackc.low %vm271_vm10, %vm269_vm8  ;;  %vm272_vm8 = vcmp.eq.s32.totalorder %v249_v17, %v956_v13  ;;  %vm274_vm10 = vcmp.eq.s32.totalorder %v250_v18, %v956_v13 }
  0x1d   : > { %847 = vmatprep.subr.msk.bf16.mxu0 %vm846_vm9, %v890_v14  ;;  %vm832_vm7 = vmpackc.low %vm327_vm13, %vm325_vm12 }
  0x1e   : > { %833 = vmatpush1.bf16.msk.msra.mxu1 %vm832_vm7, %v890_v14  ;;  %vm848_vm11 = vmpackc.low %vm270_vm2, %vm268_vm15  ;;  %vm373_vm15 = vcmask 523264   ;;  %vm585_vm2 = vcmask 261120  }
  0x1f   : > { %849 = vmatpush1.bf16.msk.msra.mxu0 %vm848_vm11, %v890_v14  ;;  %vm834_vm14 = vmpackc.low %vm332_vm1, %vm330_vm0  ;;  %vm680_vm0 = vcmp.lt.s32.totalorder %v242_v0, 256 }
  0x20   : > { %835 = vmatprep.subr.msk.bf16.mxu1 %vm834_vm14, %v890_v14  ;;  %vm850_vm9 = vmpackc.low %vm275_vm4, %vm273_vm3 }
  0x21   : > { %851 = vmatprep.subr.msk.bf16.mxu0 %vm850_vm9, %v890_v14  ;;  %vm836_vm12 = vmpackc.low %vm331_vm6, %vm329_vm5 }
  0x22   : > { %837 = vmatpush1.bf16.msk.msra.mxu1 %vm836_vm12, %v890_v14  ;;  %vm852_vm13 = vmpackc.low %vm274_vm10, %vm272_vm8 }
  0x23   : > { %853 = vmatpush1.bf16.msk.msra.mxu0 %vm852_vm13, %v890_v14 }
  0x25   : > { %795 = vmatmul.mubr.msk.f32.vlgmr.msra.gmra.mrb[0].mxu1 %vm373_vm15, %v369_v19 }
  0x26   : > { %815 = vmatmul.mubr.msk.f32.vlgmr.msra.gmra.mrb[0].mxu0 %vm373_vm15, %v365_v20  ;;  %456 = vmatprep.mubr.f32.mxu1 %v889_v1 }
  0x27   : > { %557 = vmatprep.mubr.f32.mxu0 %v889_v1 }
  0x29   : > { %796 = vmatmul.mubr.msk.f32.gmra.mrb[2].mxu1 %vm373_vm15, %v370_v21 }
  0x2a   : > { %816 = vmatmul.mubr.msk.f32.gmra.mrb[2].mxu0 %vm373_vm15, %v366_v22  ;;  %462 = vmatprep.mubr.f32.mxu1 %v889_v1 }
  0x2b   : > { %563 = vmatprep.mubr.f32.mxu0 %v889_v1 }
  0x2d   : > { %797 = vmatmul.mubr.msk.f32.gmra.mrb[4].mxu1 %vm373_vm15, %v371_v23 }
  0x2e   : > { %817 = vmatmul.mubr.msk.f32.gmra.mrb[4].mxu0 %vm373_vm15, %v367_v24  ;;  %468 = vmatprep.mubr.f32.mxu1 %v889_v1 }
  0x2f   : > { %569 = vmatprep.mubr.f32.mxu0 %v889_v1 }
  0x31   : > { %798 = vmatmul.mubr.msk.f32.gmra.mrb[6].mxu1 %vm373_vm15, %v372_v25 }
  0x32   : > { %818 = vmatmul.mubr.msk.f32.gmra.mrb[6].mxu0 %vm373_vm15, %v368_v26  ;;  %653 = vmatprep.mubr.f32.mxu1 %v889_v1  ;;  %v891_v1 = vmov 1966171168  }
  0x33   : > { %v664_v3 = vunpack.c.l.s4 %v891_v1 }
  0x35   : > { %v665_v4 = vunpack.c.0.s8 %v664_v3 }
  0x37   : > { %v668_v6 = vsub.s32 %v665_v4, %v933_v2 }
  0xf8   : > { %v452_v27 = vpop.f32.mrb[0].mxu1 }
  0xf9   : > { %v553_v28 = vpop.f32.mrb[0].mxu0  ;;  %v454_v29 = vpop.f32.mrb[1].mxu1 }
  0xfa   : > { %v554_v30 = vadd.f32 %v553_v28, %v452_v27  ;;  %v555_v31 = vpop.f32.mrb[1].mxu0 }
  0xfb   : > { %v556_v32 = vadd.f32 %v555_v31, %v454_v29 }
  0xfc   : > { %v458_v33 = vpop.f32.mrb[2].mxu1  ;;  %v576_v39 = vmax.f32 %v554_v30, 0.0 }
  0xfd   : > { %v559_v34 = vpop.f32.mrb[2].mxu0  ;;  %v460_v35 = vpop.f32.mrb[3].mxu1  ;;  %v577_v42 = vmax.f32 %v556_v32, 0.0 }
  0xfe   : > { %v560_v36 = vadd.f32 %v559_v34, %v458_v33  ;;  %v561_v37 = vpop.f32.mrb[3].mxu0 }
  0xff   : > { %v562_v38 = vadd.f32 %v561_v37, %v460_v35 }
 0x100   : > { %v578_v40 = vmax.f32 %v560_v36, 0.0  ;;  %v464_v41 = vpop.f32.mrb[4].mxu1 }
 0x101   : > { %v579_v43 = vmax.f32 %v562_v38, 0.0  ;;  %v565_v44 = vpop.f32.mrb[4].mxu0  ;;  %v466_v45 = vpop.f32.mrb[5].mxu1 }
 0x102   : > { %v856_v46 = vpack.c.bf16 %v578_v40, %v576_v39  ;;  %v566_v47 = vadd.f32 %v565_v44, %v464_v41  ;;  %v567_v48 = vpop.f32.mrb[5].mxu0 }
 0x103   : > { %v854_v49 = vpack.c.bf16 %v579_v43, %v577_v42  ;;  %v568_v50 = vadd.f32 %v567_v48, %v466_v45 }
 0x104   : > { %v470_v51 = vpop.f32.mrb[6].mxu1  ;;  %v580_v57 = vmax.f32 %v566_v47, 0.0 }
 0x105   : > { %v571_v52 = vpop.f32.mrb[6].mxu0  ;;  %855 = vmatprep.subr.bf16.mxu1 %v854_v49  ;;  %v472_v53 = vpop.f32.mrb[7].mxu1  ;;  %v581_v59 = vmax.f32 %v568_v50, 0.0 }
 0x106   : > { %v572_v54 = vadd.f32 %v571_v52, %v470_v51  ;;  %v573_v55 = vpop.f32.mrb[7].mxu0  ;;  %857 = vmatpush1.bf16.msra.mxu1 %v856_v46 }
 0x107   : > { %v574_v56 = vadd.f32 %v573_v55, %v472_v53 }
 0x108   : > { %v582_v58 = vmax.f32 %v572_v54, 0.0 }
 0x109   : > { %v583_v60 = vmax.f32 %v574_v56, 0.0 }
 0x10a   : > { %v860_v61 = vpack.c.bf16 %v582_v58, %v580_v57 }
 0x10b   : > { %v858_v62 = vpack.c.bf16 %v583_v60, %v581_v59 }
 0x10d   : > { %859 = vmatprep.subr.bf16.mxu1 %v858_v62 }
 0x10e   : > { %861 = vmatpush1.bf16.msra.mxu1 %v860_v61 }
 0x111   : > { %819 = vmatmul.mubr.msk.f32.vlgmr.msra.gmra.mrb[8].mxu1 %vm585_vm2, %v584_v63 }
 0x1e4   : > { %v655_v5 = vpop.f32.mrb[8].mxu1 }
 0x1e5   : > { %v657_v7 = vpop.f32.mrb[9].mxu1 }
 0x1e6   : > { %v662_v8 = vcombine.low %v655_v5, %v657_v7 }
 0x1e8   : > { %v669_v9 = vrot.slane %v662_v8, %v668_v6 }
 0x1ea   : > { %v676_v10 = vrot.slane %v669_v9, %v668_v6 }
 0x1ec   : > { %682 = vst.msk [vmem:[%s240_s24] sm:$0x3] %vm680_vm0, %v676_v10 }
 0x1ed PF: > { %s15_s18 = sadd.s32 1, %s887_s18  }
 0x1ee   : > { %p12_p4 = scmp.ge.s32.totalorder %s15_s18, 4  }
 0x1f0   :  { %14 = sbr.rel (!%p12_p4) target bundleno = 1 (0x1), region = 73 }

</bundles_post_ra>
